<compile_context>
chip_gen: v7x
topology: tpu7x:2x2x1
jax: 0.10.0
libtpu: 0.0.40
codegen_flags: <defaults>
</compile_context>

<pallas_src>
import functools

import jax
import jax.numpy as jnp
from jax.experimental import pallas as pl
from jax.experimental.pallas import tpu as pltpu

_LANE = 128
_SUBLANE = 8


def _pad_to(v, m):
    return ((v + m - 1) // m) * m


def _sage_fused_kernel(a_ref, x_ref, wl_ref, wr_ref, b_ref, o_ref, *,
                       num_layers):
    """Full SAGE forward: num_layers fused SAGEConv layers.

    a_ref  : [Np, Np]       raw 0/1 adjacency (row i = neighbors of node i)
    x_ref  : [Np, Fp]       zero-padded node features
    wl_ref : [L, Fp, Fp]    per-layer W_l^T (applied to aggregated features)
    wr_ref : [L, Fp, Fp]    per-layer W_r^T (applied to root/self features)
    b_ref  : [L, 1, Fp]     per-layer bias of lin_l
    o_ref  : [Np, Fp]       padded output
    """
    # Mean-aggregation normalizer, computed ONCE (A constant across layers).
    a = a_ref[...]
    deg = jnp.sum(a, axis=1, keepdims=True)
    a_norm = a * (1.0 / jnp.maximum(deg, 1.0))

    x = x_ref[...]
    for layer in range(num_layers):
        # mean over neighbors via pre-normalized adjacency.
        agg = jnp.dot(a_norm, x, preferred_element_type=jnp.float32)
        h = (jnp.dot(agg, wl_ref[layer], preferred_element_type=jnp.float32)
             + jnp.dot(x, wr_ref[layer], preferred_element_type=jnp.float32)
             + b_ref[layer])
        if layer < num_layers - 1:
            x = jnp.maximum(h, 0.0)            # relu (dropout = identity, eval)
        else:
            # sigmoid = 1 / (1 + exp(-h)); reciprocal goes to the EUP slot.
            x = pl.reciprocal(1.0 + jnp.exp(-h), approx=True)
    o_ref[...] = x.astype(o_ref.dtype)


def init_sage_params(key, in_channels, hidden_channels, out_channels,
                     num_layers):
    """SAGEConv params, stacked and lane-padded.

    Returns (w_l_all [L, Fp, Fp], w_r_all [L, Fp, Fp], b_all [L, 1, Fp],
    out_channels) with Fp = 128-padded max feature width. Layer l holds
    W_l^T (aggregated-features weight) / W_r^T (root weight); bias belongs
    to lin_l (PyG default).
    """
    dims = [in_channels] + [hidden_channels] * (num_layers - 1) + [out_channels]
    fpad = _pad_to(max(dims), _LANE)
    w_l_all = jnp.zeros((num_layers, fpad, fpad), jnp.float32)
    w_r_all = jnp.zeros((num_layers, fpad, fpad), jnp.float32)
    b_all = jnp.zeros((num_layers, 1, fpad), jnp.float32)
    for layer in range(num_layers):
        f_in, f_out = dims[layer], dims[layer + 1]
        key, k1, k2, k3 = jax.random.split(key, 4)
        scale = 1.0 / jnp.sqrt(jnp.float32(f_in))
        w_l = jax.random.uniform(k1, (f_in, f_out), jnp.float32, -scale, scale)
        w_r = jax.random.uniform(k2, (f_in, f_out), jnp.float32, -scale, scale)
        b = jax.random.uniform(k3, (f_out,), jnp.float32, -scale, scale)
        w_l_all = w_l_all.at[layer, :f_in, :f_out].set(w_l)
        w_r_all = w_r_all.at[layer, :f_in, :f_out].set(w_r)
        b_all = b_all.at[layer, 0, :f_out].set(b)
    return w_l_all, w_r_all, b_all, out_channels


def sage_forward(x, adj, params, dropout_p=0.5, training=False):
    """Full SAGE.forward. adj is a dense 0/1 adjacency [N, N]."""
    del dropout_p, training  # inference: F.dropout is identity
    n, f_in = x.shape
    w_l_all, w_r_all, b_all, out_channels = params
    num_layers, fpad, _ = w_l_all.shape

    # Pad node dim to the 8-row sublane, features to 128 lanes (once).
    n_pad = _pad_to(n, _SUBLANE)
    x_pad = jnp.zeros((n_pad, fpad), jnp.float32).at[:n, :f_in].set(x)
    a_pad = jnp.zeros((n_pad, n_pad), jnp.float32).at[:n, :n].set(
        adj.astype(jnp.float32))

    kernel = functools.partial(_sage_fused_kernel, num_layers=num_layers)
    out_pad = pl.pallas_call(
        kernel,
        out_shape=jax.ShapeDtypeStruct((n_pad, fpad), jnp.float32),
        grid=(1,),
        in_specs=[
            pl.BlockSpec((n_pad, n_pad), lambda i: (0, 0)),                 # A
            pl.BlockSpec((n_pad, fpad), lambda i: (0, 0)),                  # X
            pl.BlockSpec((num_layers, fpad, fpad), lambda i: (0, 0, 0)),    # W_l
            pl.BlockSpec((num_layers, fpad, fpad), lambda i: (0, 0, 0)),    # W_r
            pl.BlockSpec((num_layers, 1, fpad), lambda i: (0, 0, 0)),       # b
        ],
        out_specs=pl.BlockSpec((n_pad, fpad), lambda i: (0, 0)),
        compiler_params=pltpu.CompilerParams(
            dimension_semantics=("arbitrary",),
            vmem_limit_bytes=64 << 20),
    )(a_pad, x_pad, w_l_all, w_r_all, b_all)
    return out_pad[:n, :out_channels]


def sage_reference(x, adj, params):
    """Pure-JAX reference (same math) for correctness checking."""
    w_l_all, w_r_all, b_all, out_channels = params
    num_layers, fpad, _ = w_l_all.shape
    n, f_in = x.shape
    deg = jnp.maximum(adj.sum(axis=1, keepdims=True), 1.0)
    a_norm = adj / deg
    h = jnp.zeros((n, fpad), jnp.float32).at[:, :f_in].set(x)
    for layer in range(num_layers):
        agg = a_norm @ h
        out = agg @ w_l_all[layer] + h @ w_r_all[layer] + b_all[layer]
        h = jnp.maximum(out, 0.0) if layer < num_layers - 1 else jax.nn.sigmoid(out)
    return h[:, :out_channels]


if __name__ == "__main__":
    # Small, module-consistent shapes.
    N = 64              # number of graph nodes
    IN_CHANNELS = 16
    HIDDEN_CHANNELS = 32
    OUT_CHANNELS = 8
    NUM_LAYERS = 3
    DROPOUT = 0.5       # inference mode => identity

    key = jax.random.PRNGKey(0)
    key, kx, ka = jax.random.split(key, 3)

    x = jax.random.normal(kx, (N, IN_CHANNELS), dtype=jnp.float32)
    # Random symmetric-ish 0/1 adjacency with self loops.
    adj = (jax.random.uniform(ka, (N, N)) < 0.1).astype(jnp.float32)
    adj = jnp.maximum(adj, adj.T)
    adj = jnp.maximum(adj, jnp.eye(N, dtype=jnp.float32))

    params = init_sage_params(key, IN_CHANNELS, HIDDEN_CHANNELS,
                              OUT_CHANNELS, NUM_LAYERS)

    out = jax.block_until_ready(
        sage_forward(x, adj, params, dropout_p=DROPOUT, training=False))
    ref = sage_reference(x, adj, params)

    assert out.shape == (N, OUT_CHANNELS)
    assert bool(jnp.all(jnp.isfinite(out)))
    # approx EUP reciprocal in the sigmoid => small tolerance vs. exact ref
    assert bool(jnp.allclose(out, ref, atol=2e-3, rtol=2e-3))
    print("KERNEL_OK")
</pallas_src>

<mosaic_0001>
module attributes {stable_mosaic.version = 11 : i64} {
  func.func @_sage_fused_kernel(%arg0: i32, %arg1: memref<64x64xf32, #tpu.memory_space<vmem>>, %arg2: memref<64x128xf32, #tpu.memory_space<vmem>>, %arg3: memref<3x128x128xf32, #tpu.memory_space<vmem>>, %arg4: memref<3x128x128xf32, #tpu.memory_space<vmem>>, %arg5: memref<3x1x128xf32, #tpu.memory_space<vmem>>, %arg6: memref<64x128xf32, #tpu.memory_space<vmem>>) attributes {dimension_semantics = [#tpu.dimension_semantics<arbitrary>], iteration_bounds = array<i64: 1>, scalar_prefetch = 0 : i64, scratch_operands = 0 : i64, tpu.core_type = #tpu.core_type<tc>, window_params = [{pipeline_mode = #tpu.pipeline_mode<synchronous>, transform_indices = @transform_0, window_bounds = array<i64: 64, 64>}, {pipeline_mode = #tpu.pipeline_mode<synchronous>, transform_indices = @transform_1, window_bounds = array<i64: 64, 128>}, {pipeline_mode = #tpu.pipeline_mode<synchronous>, transform_indices = @transform_2, window_bounds = array<i64: 3, 128, 128>}, {pipeline_mode = #tpu.pipeline_mode<synchronous>, transform_indices = @transform_3, window_bounds = array<i64: 3, 128, 128>}, {pipeline_mode = #tpu.pipeline_mode<synchronous>, transform_indices = @transform_4, window_bounds = array<i64: 3, 1, 128>}, {pipeline_mode = #tpu.pipeline_mode<synchronous>, transform_indices = @transform_5, window_bounds = array<i64: 64, 128>}]} {
    %c0 = arith.constant 0 : index
    %c0_0 = arith.constant 0 : index
    %0 = vector.load %arg1[%c0, %c0_0] : memref<64x64xf32, #tpu.memory_space<vmem>>, vector<64x64xf32>
    %cst = arith.constant dense<0.000000e+00> : vector<64xf32>
    %1 = vector.multi_reduction <add>, %0, %cst [1] : vector<64x64xf32> to vector<64xf32>
    %2 = vector.shape_cast %1 : vector<64xf32> to vector<64x1xf32>
    %cst_1 = arith.constant 1.000000e+00 : f32
    %3 = vector.broadcast %cst_1 : f32 to vector<64x1xf32>
    %4 = arith.maximumf %2, %3 : vector<64x1xf32>
    %cst_2 = arith.constant 1.000000e+00 : f32
    %5 = vector.broadcast %cst_2 : f32 to vector<64x1xf32>
    %6 = arith.divf %5, %4 : vector<64x1xf32>
    %7 = vector.broadcast %6 : vector<64x1xf32> to vector<64x64xf32>
    %8 = arith.mulf %0, %7 : vector<64x64xf32>
    %c0_3 = arith.constant 0 : index
    %c0_4 = arith.constant 0 : index
    %9 = vector.load %arg2[%c0_3, %c0_4] : memref<64x128xf32, #tpu.memory_space<vmem>>, vector<64x128xf32>
    %cst_5 = arith.constant dense<0.000000e+00> : vector<64x128xf32>
    %10 = tpu.matmul %8, %9, %cst_5 {dimension_numbers = #tpu.dot_dimension_numbers<[1], [0], [0], [1], [0, 0, 1, 1], [], []>} : vector<64x64xf32>, vector<64x128xf32>, vector<64x128xf32> -> vector<64x128xf32>
    %c0_6 = arith.constant 0 : index
    %c0_7 = arith.constant 0 : index
    %c0_8 = arith.constant 0 : index
    %11 = vector.load %arg3[%c0_6, %c0_7, %c0_8] : memref<3x128x128xf32, #tpu.memory_space<vmem>>, vector<1x128x128xf32>
    %12 = vector.shape_cast %11 : vector<1x128x128xf32> to vector<128x128xf32>
    %cst_9 = arith.constant dense<0.000000e+00> : vector<64x128xf32>
    %13 = tpu.matmul %10, %12, %cst_9 {dimension_numbers = #tpu.dot_dimension_numbers<[1], [0], [0], [1], [0, 0, 1, 1], [], []>} : vector<64x128xf32>, vector<128x128xf32>, vector<64x128xf32> -> vector<64x128xf32>
    %c0_10 = arith.constant 0 : index
    %c0_11 = arith.constant 0 : index
    %c0_12 = arith.constant 0 : index
    %14 = vector.load %arg4[%c0_10, %c0_11, %c0_12] : memref<3x128x128xf32, #tpu.memory_space<vmem>>, vector<1x128x128xf32>
    %15 = vector.shape_cast %14 : vector<1x128x128xf32> to vector<128x128xf32>
    %cst_13 = arith.constant dense<0.000000e+00> : vector<64x128xf32>
    %16 = tpu.matmul %9, %15, %cst_13 {dimension_numbers = #tpu.dot_dimension_numbers<[1], [0], [0], [1], [0, 0, 1, 1], [], []>} : vector<64x128xf32>, vector<128x128xf32>, vector<64x128xf32> -> vector<64x128xf32>
    %17 = arith.addf %13, %16 : vector<64x128xf32>
    %c0_14 = arith.constant 0 : index
    %c0_15 = arith.constant 0 : index
    %c0_16 = arith.constant 0 : index
    %18 = vector.load %arg5[%c0_14, %c0_15, %c0_16] : memref<3x1x128xf32, #tpu.memory_space<vmem>>, vector<1x1x128xf32>
    %19 = vector.shape_cast %18 : vector<1x1x128xf32> to vector<1x128xf32>
    %20 = vector.broadcast %19 : vector<1x128xf32> to vector<64x128xf32>
    %21 = arith.addf %17, %20 : vector<64x128xf32>
    %cst_17 = arith.constant 0.000000e+00 : f32
    %22 = vector.broadcast %cst_17 : f32 to vector<64x128xf32>
    %23 = arith.maximumf %21, %22 : vector<64x128xf32>
    %cst_18 = arith.constant dense<0.000000e+00> : vector<64x128xf32>
    %24 = tpu.matmul %8, %23, %cst_18 {dimension_numbers = #tpu.dot_dimension_numbers<[1], [0], [0], [1], [0, 0, 1, 1], [], []>} : vector<64x64xf32>, vector<64x128xf32>, vector<64x128xf32> -> vector<64x128xf32>
    %c1 = arith.constant 1 : index
    %c0_19 = arith.constant 0 : index
    %c0_20 = arith.constant 0 : index
    %25 = vector.load %arg3[%c1, %c0_19, %c0_20] : memref<3x128x128xf32, #tpu.memory_space<vmem>>, vector<1x128x128xf32>
    %26 = vector.shape_cast %25 : vector<1x128x128xf32> to vector<128x128xf32>
    %cst_21 = arith.constant dense<0.000000e+00> : vector<64x128xf32>
    %27 = tpu.matmul %24, %26, %cst_21 {dimension_numbers = #tpu.dot_dimension_numbers<[1], [0], [0], [1], [0, 0, 1, 1], [], []>} : vector<64x128xf32>, vector<128x128xf32>, vector<64x128xf32> -> vector<64x128xf32>
    %c1_22 = arith.constant 1 : index
    %c0_23 = arith.constant 0 : index
    %c0_24 = arith.constant 0 : index
    %28 = vector.load %arg4[%c1_22, %c0_23, %c0_24] : memref<3x128x128xf32, #tpu.memory_space<vmem>>, vector<1x128x128xf32>
    %29 = vector.shape_cast %28 : vector<1x128x128xf32> to vector<128x128xf32>
    %cst_25 = arith.constant dense<0.000000e+00> : vector<64x128xf32>
    %30 = tpu.matmul %23, %29, %cst_25 {dimension_numbers = #tpu.dot_dimension_numbers<[1], [0], [0], [1], [0, 0, 1, 1], [], []>} : vector<64x128xf32>, vector<128x128xf32>, vector<64x128xf32> -> vector<64x128xf32>
    %31 = arith.addf %27, %30 : vector<64x128xf32>
    %c1_26 = arith.constant 1 : index
    %c0_27 = arith.constant 0 : index
    %c0_28 = arith.constant 0 : index
    %32 = vector.load %arg5[%c1_26, %c0_27, %c0_28] : memref<3x1x128xf32, #tpu.memory_space<vmem>>, vector<1x1x128xf32>
    %33 = vector.shape_cast %32 : vector<1x1x128xf32> to vector<1x128xf32>
    %34 = vector.broadcast %33 : vector<1x128xf32> to vector<64x128xf32>
    %35 = arith.addf %31, %34 : vector<64x128xf32>
    %cst_29 = arith.constant 0.000000e+00 : f32
    %36 = vector.broadcast %cst_29 : f32 to vector<64x128xf32>
    %37 = arith.maximumf %35, %36 : vector<64x128xf32>
    %cst_30 = arith.constant dense<0.000000e+00> : vector<64x128xf32>
    %38 = tpu.matmul %8, %37, %cst_30 {dimension_numbers = #tpu.dot_dimension_numbers<[1], [0], [0], [1], [0, 0, 1, 1], [], []>} : vector<64x64xf32>, vector<64x128xf32>, vector<64x128xf32> -> vector<64x128xf32>
    %c2 = arith.constant 2 : index
    %c0_31 = arith.constant 0 : index
    %c0_32 = arith.constant 0 : index
    %39 = vector.load %arg3[%c2, %c0_31, %c0_32] : memref<3x128x128xf32, #tpu.memory_space<vmem>>, vector<1x128x128xf32>
    %40 = vector.shape_cast %39 : vector<1x128x128xf32> to vector<128x128xf32>
    %cst_33 = arith.constant dense<0.000000e+00> : vector<64x128xf32>
    %41 = tpu.matmul %38, %40, %cst_33 {dimension_numbers = #tpu.dot_dimension_numbers<[1], [0], [0], [1], [0, 0, 1, 1], [], []>} : vector<64x128xf32>, vector<128x128xf32>, vector<64x128xf32> -> vector<64x128xf32>
    %c2_34 = arith.constant 2 : index
    %c0_35 = arith.constant 0 : index
    %c0_36 = arith.constant 0 : index
    %42 = vector.load %arg4[%c2_34, %c0_35, %c0_36] : memref<3x128x128xf32, #tpu.memory_space<vmem>>, vector<1x128x128xf32>
    %43 = vector.shape_cast %42 : vector<1x128x128xf32> to vector<128x128xf32>
    %cst_37 = arith.constant dense<0.000000e+00> : vector<64x128xf32>
    %44 = tpu.matmul %37, %43, %cst_37 {dimension_numbers = #tpu.dot_dimension_numbers<[1], [0], [0], [1], [0, 0, 1, 1], [], []>} : vector<64x128xf32>, vector<128x128xf32>, vector<64x128xf32> -> vector<64x128xf32>
    %45 = arith.addf %41, %44 : vector<64x128xf32>
    %c2_38 = arith.constant 2 : index
    %c0_39 = arith.constant 0 : index
    %c0_40 = arith.constant 0 : index
    %46 = vector.load %arg5[%c2_38, %c0_39, %c0_40] : memref<3x1x128xf32, #tpu.memory_space<vmem>>, vector<1x1x128xf32>
    %47 = vector.shape_cast %46 : vector<1x1x128xf32> to vector<1x128xf32>
    %48 = vector.broadcast %47 : vector<1x128xf32> to vector<64x128xf32>
    %49 = arith.addf %45, %48 : vector<64x128xf32>
    %cst_41 = arith.constant 0.000000e+00 : f32
    %50 = vector.broadcast %cst_41 : f32 to vector<64x128xf32>
    %51 = arith.subf %50, %49 : vector<64x128xf32>
    %52 = math.exp %51 : vector<64x128xf32>
    %cst_42 = arith.constant 1.000000e+00 : f32
    %53 = vector.broadcast %cst_42 : f32 to vector<64x128xf32>
    %54 = arith.addf %53, %52 : vector<64x128xf32>
    %55 = tpu.reciprocal %54 {approx = true} : vector<64x128xf32> -> vector<64x128xf32>
    %c0_43 = arith.constant 0 : index
    %c0_44 = arith.constant 0 : index
    %56 = vector.load %arg6[%c0_43, %c0_44] : memref<64x128xf32, #tpu.memory_space<vmem>>, vector<64x128xf32>
    tpu.vector_store %arg6[%c0_43, %c0_44], %55 {strides = array<i32>} : memref<64x128xf32, #tpu.memory_space<vmem>>, vector<64x128xf32>,
    return
  }
  func.func @transform_0(%arg0: i32) -> (i32, i32) {
    %c0_i32 = arith.constant 0 : i32
    %c0_i32_0 = arith.constant 0 : i32
    %c0_i32_1 = arith.constant 0 : i32
    return %c0_i32, %c0_i32_0 : i32, i32
  }
  func.func @transform_1(%arg0: i32) -> (i32, i32) {
    %c0_i32 = arith.constant 0 : i32
    %c0_i32_0 = arith.constant 0 : i32
    %c0_i32_1 = arith.constant 0 : i32
    return %c0_i32, %c0_i32_0 : i32, i32
  }
  func.func @transform_2(%arg0: i32) -> (i32, i32, i32) {
    %c0_i32 = arith.constant 0 : i32
    %c0_i32_0 = arith.constant 0 : i32
    %c0_i32_1 = arith.constant 0 : i32
    %c0_i32_2 = arith.constant 0 : i32
    return %c0_i32, %c0_i32_0, %c0_i32_1 : i32, i32, i32
  }
  func.func @transform_3(%arg0: i32) -> (i32, i32, i32) {
    %c0_i32 = arith.constant 0 : i32
    %c0_i32_0 = arith.constant 0 : i32
    %c0_i32_1 = arith.constant 0 : i32
    %c0_i32_2 = arith.constant 0 : i32
    return %c0_i32, %c0_i32_0, %c0_i32_1 : i32, i32, i32
  }
  func.func @transform_4(%arg0: i32) -> (i32, i32, i32) {
    %c0_i32 = arith.constant 0 : i32
    %c0_i32_0 = arith.constant 0 : i32
    %c0_i32_1 = arith.constant 0 : i32
    %c0_i32_2 = arith.constant 0 : i32
    return %c0_i32, %c0_i32_0, %c0_i32_1 : i32, i32, i32
  }
  func.func @transform_5(%arg0: i32) -> (i32, i32) {
    %c0_i32 = arith.constant 0 : i32
    %c0_i32_0 = arith.constant 0 : i32
    %c0_i32_1 = arith.constant 0 : i32
    return %c0_i32, %c0_i32_0 : i32, i32
  }
}

</mosaic_0001>

<bundles_post_ra>
// kernel: tpu_custom_call.1
= control target key start
LH: loop header
LB: loop body
LE: loop exit
PB: predicated region body
PF: predicated region fallthrough
CT: control target
= control target key end

     0   :  { %10 = vsyncpa [#allocation3], 0  ;;  %s2779_s0 = inlined_call_operand.hbm [shape: f32[64,64], index: 0, kind: input, shape index: {}]   ;;  %s2780_s1 = inlined_call_operand.hbm [shape: f32[64,128], index: 1, kind: input, shape index: {}]   ;;  %s2781_s2 = inlined_call_operand.hbm [shape: f32[3,128,128], index: 2, kind: input, shape index: {}]   ;;  %s2782_s3 = inlined_call_operand.hbm [shape: f32[3,128,128], index: 3, kind: input, shape index: {}]   ;;  %s2783_s4 = inlined_call_operand.hbm [shape: f32[3,1,128], index: 4, kind: input, shape index: {}]   ;;  %s2784_s5 = inlined_call_operand.hbm [shape: f32[64,128], index: 5, kind: output, shape index: {}]  }
   0x1   :  { %11 = vsyncpa [#allocation6], 0 }
   0x2   :  { %12 = vsyncpa [#allocation9], 0 }
   0x3   :  { %13 = vsyncpa [#allocation4], 0  ;;  %s2390_s18 = smov [#allocation5]   ;;  %s2391_s20 = smov [#allocation8]  }
   0x4   :  { %s31_s19 = sshll.u32 %s2390_s18, 4  ;;  %s55_s21 = sshll.u32 %s2391_s20, 4  ;;  %s32_s19 = int_to_ptr.vmem [resolvable:$true] %s31_s19  ;;  %s2430_s21 = int_to_ptr.vmem [resolvable:$true] %s55_s21 }
   0x5   :  { %s2250_s24 = scalar_lea.hbm %s2780_s1, 1024 }
   0x6   :  { %p2251_p0 = scmp.ne.s32.totalorder %s2780_s1, %s2250_s24  ;;  %p2254_p1 = scmp.lt.u32.totalorder %s2250_s24, %s2780_s1 }
   0x8   :  { %p2256_p2 = pnand %p2254_p1, %p2251_p0 }
   0xa   :  { %2259 = shalt.err (!%p2256_p2)
}
   0xb   :  { %s2260_s29 = scalar_lea.vmem %s32_s19, 1024  ;;  %p2265_p4 = scmp.lt.s32.totalorder %s32_s19, %s32_s19 }
   0xc   :  { %p2261_p3 = scmp.ne.s32.totalorder %s32_s19, %s2260_s29  ;;  %p2266_p5 = scmp.lt.s32.totalorder %s2260_s29, %s2260_s29 }
   0xe   :  { %p2267_p6 = por %p2266_p5, %p2265_p4 }
  0x10   :  { %p2268_p7 = pnand %p2267_p6, %p2261_p3 }
  0x12   :  { %2271 = shalt.err (!%p2268_p7)
}
  0x13   :  { %s2392_s30 = smov 128   ;;  %s2393_s6 = smov 8  }
  0x14   :  { %37 = dma.hbm_to_vmem [thread:$0]  %s2780_s1, 1024, %s32_s19, [#allocation6], %s2392_s30, %s2392_s30, %s2393_s6  }
  0x15   :  { %s2272_s11 = scalar_lea.hbm %s2782_s3, 6144 }
  0x16   :  { %p2273_p8 = scmp.ne.s32.totalorder %s2782_s3, %s2272_s11  ;;  %p2276_p9 = scmp.lt.u32.totalorder %s2272_s11, %s2782_s3 }
  0x18   :  { %p2278_p10 = pnand %p2276_p9, %p2273_p8 }
  0x1a   :  { %2281 = shalt.err (!%p2278_p10)
}
  0x1b   :  { %s2282_s16 = scalar_lea.vmem %s2430_s21, 6144  ;;  %p2287_p12 = scmp.lt.s32.totalorder %s2430_s21, %s2430_s21 }
  0x1c   :  { %p2283_p11 = scmp.ne.s32.totalorder %s2430_s21, %s2282_s16  ;;  %p2288_p13 = scmp.lt.s32.totalorder %s2282_s16, %s2282_s16 }
  0x1e   :  { %p2289_p0 = por %p2288_p13, %p2287_p12 }
  0x20   :  { %p2290_p1 = pnand %p2289_p0, %p2283_p11 }
  0x22   :  { %2293 = shalt.err (!%p2290_p1)
}
  0x23   :  { %61 = dma.hbm_to_vmem [thread:$0]  %s2782_s3, 6144, %s2430_s21, [#allocation9], %s2392_s30, %s2392_s30, %s2393_s6  }
  0x24   :  { %s2394_s18 = smov [#allocation2]   ;;  %s2395_s20 = smov [#allocation7]  }
  0x25   :  { %s19_s19 = sshll.u32 %s2394_s18, 4  ;;  %s43_s22 = sshll.u32 %s2395_s20, 4  ;;  %s20_s19 = int_to_ptr.vmem [resolvable:$true] %s19_s19  ;;  %s2467_s22 = int_to_ptr.vmem [resolvable:$true] %s43_s22 }
  0x26   :  { %s2294_s25 = scalar_lea.hbm %s2779_s0, 1024 }
  0x27   :  { %p2295_p2 = scmp.ne.s32.totalorder %s2779_s0, %s2294_s25  ;;  %p2298_p3 = scmp.lt.u32.totalorder %s2294_s25, %s2779_s0 }
  0x29   :  { %p2300_p4 = pnand %p2298_p3, %p2295_p2 }
  0x2b   :  { %2303 = shalt.err (!%p2300_p4)
}
  0x2c   :  { %s2304_s3 = scalar_lea.vmem %s20_s19, 1024  ;;  %p2309_p6 = scmp.lt.s32.totalorder %s20_s19, %s20_s19 }
  0x2d   :  { %p2305_p5 = scmp.ne.s32.totalorder %s20_s19, %s2304_s3  ;;  %p2310_p7 = scmp.lt.s32.totalorder %s2304_s3, %s2304_s3 }
  0x2f   :  { %p2311_p8 = por %p2310_p7, %p2309_p6 }
  0x31   :  { %p2312_p9 = pnand %p2311_p8, %p2305_p5 }
  0x33   :  { %2315 = shalt.err (!%p2312_p9)
}
  0x34   :  { %25 = dma.hbm_to_vmem [thread:$0]  %s2779_s0, 1024, %s20_s19, [#allocation3], %s2392_s30, %s2392_s30, %s2393_s6  }
  0x35   :  { %s2316_s10 = scalar_lea.hbm %s2781_s2, 6144 }
  0x36   :  { %p2317_p10 = scmp.ne.s32.totalorder %s2781_s2, %s2316_s10  ;;  %p2320_p11 = scmp.lt.u32.totalorder %s2316_s10, %s2781_s2 }
  0x38   :  { %p2322_p12 = pnand %p2320_p11, %p2317_p10 }
  0x3a   :  { %2325 = shalt.err (!%p2322_p12)
}
  0x3b   :  { %s2326_s15 = scalar_lea.vmem %s2467_s22, 6144  ;;  %p2331_p0 = scmp.lt.s32.totalorder %s2467_s22, %s2467_s22 }
  0x3c   :  { %p2327_p13 = scmp.ne.s32.totalorder %s2467_s22, %s2326_s15  ;;  %p2332_p1 = scmp.lt.s32.totalorder %s2326_s15, %s2326_s15 }
  0x3e   :  { %p2333_p2 = por %p2332_p1, %p2331_p0 }
  0x40   :  { %p2334_p3 = pnand %p2333_p2, %p2327_p13 }
  0x42   :  { %2337 = shalt.err (!%p2334_p3)
}
  0x43   :  { %49 = dma.hbm_to_vmem [thread:$0]  %s2781_s2, 6144, %s2467_s22, [#allocation6], %s2392_s30, %s2392_s30, %s2393_s6  }
  0x44   :  { %s2396_s1 = smov [#allocation10]   ;;  %s2338_s20 = scalar_lea.hbm %s2783_s4, 48 }
  0x45   :  { %s67_s17 = sshll.u32 %s2396_s1, 4  ;;  %p2339_p4 = scmp.ne.s32.totalorder %s2783_s4, %s2338_s20  ;;  %s68_s17 = int_to_ptr.vmem [resolvable:$true] %s67_s17 }
  0x46   :  { %p2342_p5 = scmp.lt.u32.totalorder %s2338_s20, %s2783_s4 }
  0x48   :  { %p2344_p6 = pnand %p2342_p5, %p2339_p4 }
  0x4a   :  { %2347 = shalt.err (!%p2344_p6)
}
  0x4b   :  { %s2348_s27 = scalar_lea.vmem %s68_s17, 48  ;;  %s2352_s2 = scalar_lea.vmem %s68_s17, 64 }
  0x4c   :  { %p2349_p7 = scmp.ne.s32.totalorder %s68_s17, %s2348_s27  ;;  %p2353_p8 = scmp.lt.s32.totalorder %s68_s17, %s68_s17 }
  0x4d   :  { %p2354_p9 = scmp.lt.s32.totalorder %s2352_s2, %s2348_s27 }
  0x4f   :  { %p2355_p10 = por %p2354_p9, %p2353_p8 }
  0x51   :  { %p2356_p11 = pnand %p2355_p10, %p2349_p7 }
  0x53   :  { %2359 = shalt.err (!%p2356_p11)
}
  0x54   :  { %s2397_s22 = smov 16   ;;  %s2398_s28 = smov 1  }
  0x55   :  { %73 = dma.hbm_to_vmem [thread:$0]  %s2783_s4, 48, %s68_s17, [#allocation9], %s2397_s22, %s2397_s22, %s2398_s28  }
  0x56   :  { %2382 = dma.done.wait [#allocation3], 1024  }
  0x57   :  { %2383 = vsyncadd [#allocation3], 4294966272 }
  0x58   :  { %2384 = dma.done.wait [#allocation6], 7168  }
  0x59   :  { %2385 = vsyncadd [#allocation6], 4294960128 }
  0x5a   :  { %2386 = dma.done.wait [#allocation9], 6192  }
  0x5b   :  { %2387 = vsyncadd [#allocation9], 4294961104  ;;  %vm97_vm0 = vcmask 523264   ;;  %v2516_v0 = vld [vmem:[#allocation2] sm:$0xff]  ;;  %v2518_v1 = vld [vmem:[#allocation2 + $0x10] sm:$0xff]  ;;  %s2399_s4 = smov [#allocation11]  }
  0x5c   :  { %v2520_v2 = vld [vmem:[#allocation2 + $0x8] sm:$0xff]  ;;  %v98_v3 = vsel %vm97_vm0, %v2516_v0, 0.0  ;;  %v104_v4 = vsel %vm97_vm0, %v2518_v1, 0.0  ;;  %v2526_v5 = vld [vmem:[#allocation2 + $0x18] sm:$0xff]  ;;  %v2532_v8 = vld [vmem:[#allocation2 + $0x20] sm:$0xff]  ;;  %s1347_s21 = sshll.u32 %s2399_s4, 4  ;;  %s1348_s21 = int_to_ptr.vmem [resolvable:$true] %s1347_s21 }
  0x5d   :  { %99 = vadd.xlane.f32.xlu0 %v98_v3  ;;  %105 = vadd.xlane.f32.xlu1 %v104_v4  ;;  %v101_v6 = vsel %vm97_vm0, %v2520_v2, 0.0  ;;  %v107_v7 = vsel %vm97_vm0, %v2526_v5, 0.0  ;;  %v2534_v9 = vld [vmem:[#allocation2 + $0x28] sm:$0xff]  ;;  %v110_v10 = vsel %vm97_vm0, %v2532_v8, 0.0  ;;  %v2540_v12 = vld [vmem:[#allocation2 + $0x30] sm:$0xff]  ;;  %v2542_v13 = vld [vmem:[#allocation2 + $0x38] sm:$0xff]  ;;  %p2365_p13 = scmp.lt.s32.totalorder %s1348_s21, %s1348_s21 }
  0x5e   :  { %v113_v11 = vsel %vm97_vm0, %v2534_v9, 0.0  ;;  %v116_v14 = vsel %vm97_vm0, %v2540_v12, 0.0  ;;  %v119_v15 = vsel %vm97_vm0, %v2542_v13, 0.0  ;;  %v2548_v16 = vld [vmem:[#allocation5] sm:$0xff]  ;;  %v2550_v17 = vld [vmem:[#allocation5 + $0x8] sm:$0xff]  ;;  %v2554_v19 = vld [vmem:[#allocation5 + $0x10] sm:$0xff] }
  0x5f   :  { %v1928_v18 = vpack.c.bf16 %v2550_v17, %v2548_v16  ;;  %v2556_v20 = vld [vmem:[#allocation5 + $0x18] sm:$0xff]  ;;  %v2560_v22 = vld [vmem:[#allocation5 + $0x20] sm:$0xff]  ;;  %v2562_v23 = vld [vmem:[#allocation5 + $0x28] sm:$0xff]  ;;  %s2360_s7 = scalar_lea.vmem %s1348_s21, 1024 }
  0x60   :  { %v1932_v21 = vpack.c.bf16 %v2556_v20, %v2554_v19  ;;  %v1936_v24 = vpack.c.bf16 %v2562_v23, %v2560_v22  ;;  %v2566_v25 = vld [vmem:[#allocation5 + $0x30] sm:$0xff]  ;;  %v2568_v26 = vld [vmem:[#allocation5 + $0x38] sm:$0xff]  ;;  %v307_v28 = vld [vmem:[#allocation8] sm:$0xff]  ;;  %p2361_p12 = scmp.ne.s32.totalorder %s1348_s21, %s2360_s7  ;;  %p2366_p0 = scmp.lt.s32.totalorder %s2360_s7, %s2360_s7 }
  0x61   :  { %102 = vadd.xlane.f32.xlu0 %v101_v6  ;;  %108 = vadd.xlane.f32.xlu1 %v107_v7  ;;  %v1940_v27 = vpack.c.bf16 %v2568_v26, %v2566_v25  ;;  %v308_v29 = vld [vmem:[#allocation8 + $0x8] sm:$0xff]  ;;  %v291_v31 = vld [vmem:[#allocation7] sm:$0xff]  ;;  %v293_v33 = vld [vmem:[#allocation7 + $0x10] sm:$0xff] }
  0x62   :  { %1929 = vmatprep.subr.bf16.mxu0 %v1928_v18  ;;  %v2572_v30 = vpack.c.bf16 %v308_v29, %v307_v28  ;;  %v292_v32 = vld [vmem:[#allocation7 + $0x8] sm:$0xff]  ;;  %v294_v35 = vld [vmem:[#allocation7 + $0x18] sm:$0xff]  ;;  %v295_v37 = vld [vmem:[#allocation7 + $0x20] sm:$0xff]  ;;  %p2367_p1 = por %p2366_p0, %p2365_p13 }
  0x63   :  { %1931 = vmatpush3.bf16.msra.mxu0 %v1928_v18  ;;  %v1976_v34 = vpack.c.bf16 %v292_v32, %v291_v31  ;;  %v1980_v36 = vpack.c.bf16 %v294_v35, %v293_v33  ;;  %v296_v38 = vld [vmem:[#allocation7 + $0x28] sm:$0xff]  ;;  %v297_v40 = vld [vmem:[#allocation7 + $0x30] sm:$0xff]  ;;  %v298_v41 = vld [vmem:[#allocation7 + $0x38] sm:$0xff] }
  0x64   :  { %1933 = vmatprep.subr.bf16.mxu0 %v1932_v21  ;;  %v1984_v39 = vpack.c.bf16 %v296_v38, %v295_v37  ;;  %v1988_v42 = vpack.c.bf16 %v298_v41, %v297_v40  ;;  %v299_v43 = vld [vmem:[#allocation7 + $0x40] sm:$0xff]  ;;  %v300_v44 = vld [vmem:[#allocation7 + $0x48] sm:$0xff]  ;;  %v301_v46 = vld [vmem:[#allocation7 + $0x50] sm:$0xff]  ;;  %p2368_p2 = pnand %p2367_p1, %p2361_p12 }
  0x65   :  { %111 = vadd.xlane.f32.xlu0 %v110_v10  ;;  %114 = vadd.xlane.f32.xlu1 %v113_v11  ;;  %v1992_v45 = vpack.c.bf16 %v300_v44, %v299_v43  ;;  %v302_v47 = vld [vmem:[#allocation7 + $0x58] sm:$0xff]  ;;  %v303_v49 = vld [vmem:[#allocation7 + $0x60] sm:$0xff]  ;;  %v304_v50 = vld [vmem:[#allocation7 + $0x68] sm:$0xff] }
  0x66   :  { %1977 = vmatprep.subr.bf16.mxu1 %v1976_v34  ;;  %v1996_v48 = vpack.c.bf16 %v302_v47, %v301_v46  ;;  %v2000_v51 = vpack.c.bf16 %v304_v50, %v303_v49  ;;  %v305_v52 = vld [vmem:[#allocation7 + $0x70] sm:$0xff]  ;;  %v306_v53 = vld [vmem:[#allocation7 + $0x78] sm:$0xff]  ;;  %v312_v35 = vld [vmem:[#allocation8 + $0x28] sm:$0xff] }
  0x67   :  { %1935 = vmatpush3.bf16.msra.mxu0 %v1932_v21  ;;  %1979 = vmatpush3.bf16.msra.mxu1 %v1976_v34  ;;  %v2004_v54 = vpack.c.bf16 %v306_v53, %v305_v52  ;;  %v311_v34 = vld [vmem:[#allocation8 + $0x20] sm:$0xff]  ;;  %v313_v38 = vld [vmem:[#allocation8 + $0x30] sm:$0xff]  ;;  %v316_v43 = vld [vmem:[#allocation8 + $0x48] sm:$0xff] }
  0x68   :  { %1937 = vmatprep.subr.bf16.mxu0 %v1936_v24  ;;  %1981 = vmatprep.subr.bf16.mxu1 %v1980_v36  ;;  %v1952_v37 = vpack.c.bf16 %v312_v35, %v311_v34  ;;  %v318_v46 = vld [vmem:[#allocation8 + $0x58] sm:$0xff]  ;;  %v319_v47 = vld [vmem:[#allocation8 + $0x60] sm:$0xff]  ;;  %v321_v49 = vld [vmem:[#allocation8 + $0x70] sm:$0xff] }
  0x69   :  { %117 = vadd.xlane.f32.xlu0 %v116_v14  ;;  %120 = vadd.xlane.f32.xlu1 %v119_v15  ;;  %v322_v50 = vld [vmem:[#allocation8 + $0x78] sm:$0xff] }
  0x6b   :  { %1939 = vmatpush3.bf16.msra.mxu0 %v1936_v24  ;;  %1983 = vmatpush3.bf16.msra.mxu1 %v1980_v36  ;;  %v309_v24 = vld [vmem:[#allocation8 + $0x10] sm:$0xff] }
  0x6c   :  { %1941 = vmatprep.subr.bf16.mxu0 %v1940_v27  ;;  %1985 = vmatprep.subr.bf16.mxu1 %v1984_v39 }
  0x6f   :  { %1943 = vmatpush3.bf16.msra.mxu0 %v1940_v27  ;;  %1987 = vmatpush3.bf16.msra.mxu1 %v1984_v39  ;;  %v310_v27 = vld [vmem:[#allocation8 + $0x18] sm:$0xff] }
  0x70   :  { %1945 = vmatprep.subr.bf16.mxu0 %v2572_v30  ;;  %1989 = vmatprep.subr.bf16.mxu1 %v1988_v42  ;;  %v1948_v33 = vpack.c.bf16 %v310_v27, %v309_v24  ;;  %v314_v39 = vld [vmem:[#allocation8 + $0x38] sm:$0xff] }
  0x73   :  { %1991 = vmatpush3.bf16.msra.mxu1 %v1988_v42  ;;  %v315_v42 = vld [vmem:[#allocation8 + $0x40] sm:$0xff] }
  0x74   :  { %1993 = vmatprep.subr.bf16.mxu1 %v1992_v45 }
  0x77   :  { %1995 = vmatpush3.bf16.msra.mxu1 %v1992_v45  ;;  %v317_v45 = vld [vmem:[#allocation8 + $0x50] sm:$0xff] }
  0x78   :  { %1997 = vmatprep.subr.bf16.mxu1 %v1996_v48 }
  0x7b   :  { %1999 = vmatpush3.bf16.msra.mxu1 %v1996_v48  ;;  %v320_v48 = vld [vmem:[#allocation8 + $0x68] sm:$0xff] }
  0x7c   :  { %2001 = vmatprep.subr.bf16.mxu1 %v2000_v51 }
  0x7f   :  { %2003 = vmatpush3.bf16.msra.mxu1 %v2000_v51  ;;  %v1972_v51 = vpack.c.bf16 %v322_v50, %v321_v49 }
  0x80   :  { %2005 = vmatprep.subr.bf16.mxu1 %v2004_v54 }
  0x83   :  { %2007 = vmatpush3.bf16.msra.mxu1 %v2004_v54 }
  0xea   :  { %v100_v55 = vpop.xlane.xlu0 %99  ;;  %v106_v56 = vpop.xlane.xlu1 %105 }
  0xeb   :  { %v122_v57 = vmax.f32 %v100_v55, 1.0  ;;  %v124_v58 = vmax.f32 %v106_v56, 1.0 }
  0xed   :  { %2202 = vrcp.f32 %v122_v57 }
  0xee   :  { %2204 = vrcp.f32 %v124_v58  ;;  %v103_v59 = vpop.xlane.xlu0 %102  ;;  %v109_v60 = vpop.xlane.xlu1 %108 }
  0xef   :  { %v123_v61 = vmax.f32 %v103_v59, 1.0  ;;  %v125_v62 = vmax.f32 %v109_v60, 1.0 }
  0xf1   :  { %2206 = vrcp.f32 %v123_v61  ;;  %v1369_v61 = vld [vmem:[#allocation10] ss:$0 sm:$0xff] }
  0xf2   :  { %2208 = vrcp.f32 %v125_v62  ;;  %v112_v63 = vpop.xlane.xlu0 %111  ;;  %v115_v3 = vpop.xlane.xlu1 %114 }
  0xf3   :  { %v126_v4 = vmax.f32 %v112_v63, 1.0  ;;  %v127_v6 = vmax.f32 %v115_v3, 1.0 }
  0xf5   :  { %2210 = vrcp.f32 %v126_v4 }
  0xf6   :  { %2212 = vrcp.f32 %v127_v6  ;;  %v118_v7 = vpop.xlane.xlu0 %117  ;;  %v121_v10 = vpop.xlane.xlu1 %120 }
  0xf7   :  { %v2203_v11 = vpop.eup %2202  ;;  %v128_v14 = vmax.f32 %v118_v7, 1.0  ;;  %v129_v15 = vmax.f32 %v121_v10, 1.0 }
  0xf8   :  { %v2205_v18 = vpop.eup %2204  ;;  %v2576_v21 = vmul.f32 %v2203_v11, %v2516_v0 }
  0xf9   :  { %2214 = vrcp.f32 %v128_v14  ;;  %v2581_v29 = vmul.f32 %v2205_v18, %v2518_v1 }
  0xfa   :  { %2216 = vrcp.f32 %v129_v15  ;;  %1596 = vmatprep.mubr.msk.f32.mxu0 %vm97_vm0, %v2576_v21 }
  0xfb   :  { %v2207_v28 = vpop.eup %2206 }
  0xfc   :  { %v2209_v31 = vpop.eup %2208  ;;  %v2584_v32 = vmul.f32 %v2207_v28, %v2520_v2 }
  0xfd   :  { %v2589_v0 = vmul.f32 %v2209_v31, %v2526_v5 }
  0xfe   :  { %1597 = vmatmul.mubr.msk.f32.vlgmr.msra.gmra.mrb[0].mxu0 %vm97_vm0, %v2584_v32 }
  0xff   :  { %v2211_v36 = vpop.eup %2210  ;;  %1947 = vmatpush3.bf16.msra.mxu0 %v2572_v30  ;;  %1599 = vmatprep.mubr.msk.f32.mxu0 %vm97_vm0, %v2581_v29 }
 0x100   :  { %v2213_v1 = vpop.eup %2212  ;;  %1949 = vmatprep.subr.bf16.mxu0 %v1948_v33  ;;  %v2595_v2 = vmul.f32 %v2211_v36, %v2532_v8  ;;  %v1956_v8 = vpack.c.bf16 %v314_v39, %v313_v38 }
 0x101   :  { %v2600_v5 = vmul.f32 %v2213_v1, %v2534_v9  ;;  %v1960_v9 = vpack.c.bf16 %v316_v43, %v315_v42 }
 0x102   :  { %1600 = vmatmul.mubr.msk.f32.gmra.mrb[2].mxu0 %vm97_vm0, %v2589_v0 }
 0x103   :  { %v2215_v40 = vpop.eup %2214  ;;  %1951 = vmatpush3.bf16.msra.mxu0 %v1948_v33  ;;  %1602 = vmatprep.mubr.msk.f32.mxu0 %vm97_vm0, %v2595_v2 }
 0x104   :  { %v2217_v30 = vpop.eup %2216  ;;  %1953 = vmatprep.subr.bf16.mxu0 %v1952_v37  ;;  %v2605_v41 = vmul.f32 %v2215_v40, %v2540_v12  ;;  %v1964_v12 = vpack.c.bf16 %v318_v46, %v317_v45 }
 0x105   :  { %v2610_v44 = vmul.f32 %v2217_v30, %v2542_v13  ;;  %v1968_v13 = vpack.c.bf16 %v320_v48, %v319_v47  ;;  %v679_v47 = vld [vmem:[#allocation8 + $0x80] sm:$0xff]  ;;  %v680_v48 = vld [vmem:[#allocation8 + $0x88] sm:$0xff] }
 0x106   :  { %1603 = vmatmul.mubr.msk.f32.gmra.mrb[4].mxu0 %vm97_vm0, %v2600_v5  ;;  %v2024_v50 = vpack.c.bf16 %v680_v48, %v679_v47  ;;  %v1378_v48 = vld [vmem:[#allocation10 + $0x1] ss:$0 sm:$0xff] }
 0x107   :  { %1955 = vmatpush3.bf16.msra.mxu0 %v1952_v37  ;;  %1605 = vmatprep.mubr.msk.f32.mxu0 %vm97_vm0, %v2605_v41 }
 0x108   :  { %1957 = vmatprep.subr.bf16.mxu0 %v1956_v8 }
 0x10a   :  { %1606 = vmatmul.mubr.msk.f32.gmra.mrb[6].mxu0 %vm97_vm0, %v2610_v44 }
 0x10b   :  { %1959 = vmatpush3.bf16.msra.mxu0 %v1956_v8  ;;  %1640 = vmatprep.mubr.f32.mxu0 %v2548_v16 }
 0x10c   :  { %1961 = vmatprep.subr.bf16.mxu0 %v1960_v9 }
 0x10f   :  { %1963 = vmatpush3.bf16.msra.mxu0 %v1960_v9 }
 0x110   :  { %1965 = vmatprep.subr.bf16.mxu0 %v1964_v12 }
 0x113   :  { %1967 = vmatpush3.bf16.msra.mxu0 %v1964_v12 }
 0x114   :  { %1969 = vmatprep.subr.bf16.mxu0 %v1968_v13 }
 0x117   :  { %1971 = vmatpush3.bf16.msra.mxu0 %v1968_v13 }
 0x118   :  { %1973 = vmatprep.subr.bf16.mxu0 %v1972_v51 }
 0x11b   :  { %1975 = vmatpush3.bf16.msra.mxu0 %v1972_v51  ;;  %v681_v51 = vld [vmem:[#allocation8 + $0x90] sm:$0xff] }
 0x11e   :  { %1641 = vmatmul.mubr.f32.vlgmr.msra.gmra.mrb[8].mxu0 %v2550_v17 }
 0x11f   :  { %1643 = vmatprep.mubr.f32.mxu0 %v2554_v19 }
 0x122   :  { %1644 = vmatmul.mubr.f32.gmra.mrb[10].mxu0 %v2556_v20 }
 0x123   :  { %1646 = vmatprep.mubr.f32.mxu0 %v2560_v22 }
 0x126   :  { %1647 = vmatmul.mubr.f32.gmra.mrb[12].mxu0 %v2562_v23 }
 0x127   :  { %1649 = vmatprep.mubr.f32.mxu0 %v2566_v25 }
 0x12a   :  { %1650 = vmatmul.mubr.f32.gmra.mrb[14].mxu0 %v2568_v26 }
 0x12b   :  { %1712 = vmatprep.mubr.msk.f32.mxu0 %vm97_vm0, %v2576_v21 }
 0x1d1   :  { %v1598_v16 = vpop.f32.mrb[0].mxu0 }
 0x1d2   :  { %v252_v52 = vpop.f32.mrb[1].mxu0 }
 0x1d3   :  { %1684 = vmatprep.mubr.f32.mxu1 %v252_v52 }
 0x1d4   :  { %1685 = vmatmul.mubr.f32.vlgmr.msra.gmra.mrb[0].mxu1 %v1598_v16  ;;  %v682_v16 = vld [vmem:[#allocation8 + $0x98] sm:$0xff] }
 0x1d5   :  { %v1601_v17 = vpop.f32.mrb[2].mxu0  ;;  %v2028_v52 = vpack.c.bf16 %v682_v16, %v681_v51 }
 0x1d6   :  { %v262_v53 = vpop.f32.mrb[3].mxu0 }
 0x1d7   :  { %1687 = vmatprep.mubr.f32.mxu1 %v262_v53  ;;  %v684_v53 = vld [vmem:[#allocation8 + $0xa8] sm:$0xff] }
 0x1d8   :  { %1688 = vmatmul.mubr.f32.gmra.mrb[2].mxu1 %v1601_v17  ;;  %v683_v17 = vld [vmem:[#allocation8 + $0xa0] sm:$0xff] }
 0x1d9   :  { %v1604_v19 = vpop.f32.mrb[4].mxu0 }
 0x1da   :  { %v272_v20 = vpop.f32.mrb[5].mxu0 }
 0x1db   :  { %1690 = vmatprep.mubr.f32.mxu1 %v272_v20  ;;  %v685_v20 = vld [vmem:[#allocation8 + $0xb0] sm:$0xff] }
 0x1dc   :  { %1691 = vmatmul.mubr.f32.gmra.mrb[4].mxu1 %v1604_v19  ;;  %v2032_v19 = vpack.c.bf16 %v684_v53, %v683_v17 }
 0x1dd   :  { %v1607_v22 = vpop.f32.mrb[6].mxu0 }
 0x1de   :  { %v282_v23 = vpop.f32.mrb[7].mxu0 }
 0x1df   :  { %1693 = vmatprep.mubr.f32.mxu1 %v282_v23 }
 0x1e0   :  { %1694 = vmatmul.mubr.f32.gmra.mrb[6].mxu1 %v1607_v22  ;;  %v686_v22 = vld [vmem:[#allocation8 + $0xb8] sm:$0xff] }
 0x1e1   :  { %1828 = vmatprep.mubr.msk.f32.mxu1 %vm97_vm0, %v2576_v21  ;;  %v2036_v23 = vpack.c.bf16 %v686_v22, %v685_v20 }
 0x1f1   :  { %v1642_v25 = vpop.f32.mrb[8].mxu0 }
 0x1f2   :  { %v389_v26 = vpop.f32.mrb[9].mxu0 }
 0x1f5   :  { %v1645_v54 = vpop.f32.mrb[10].mxu0 }
 0x1f6   :  { %v399_v55 = vpop.f32.mrb[11].mxu0 }
 0x1f9   :  { %v1648_v56 = vpop.f32.mrb[12].mxu0 }
 0x1fa   :  { %v409_v57 = vpop.f32.mrb[13].mxu0 }
 0x1fd   :  { %v1651_v58 = vpop.f32.mrb[14].mxu0 }
 0x1fe   :  { %v419_v59 = vpop.f32.mrb[15].mxu0 }
 0x2a7   :  { %v1686_v60 = vpop.f32.mrb[0].mxu1 }
 0x2a8   :  { %v500_v62 = vadd.f32 %v1686_v60, %v1642_v25  ;;  %v494_v63 = vpop.f32.mrb[1].mxu1  ;;  %v687_v25 = vld [vmem:[#allocation8 + $0xc0] sm:$0xff] }
 0x2a9   :  { %v495_v3 = vadd.f32 %v494_v63, %v389_v26  ;;  %v688_v26 = vld [vmem:[#allocation8 + $0xc8] sm:$0xff] }
 0x2aa   :  { %v2628_v4 = vadd.f32 %v1369_v61, %v500_v62  ;;  %v694_v62 = vld [vmem:[#allocation8 + $0xf8] sm:$0xff] }
 0x2ab   :  { %v2630_v6 = vadd.f32 %v1369_v61, %v495_v3  ;;  %v1689_v7 = vpop.f32.mrb[2].mxu1  ;;  %v662_v3 = vld [vmem:[#allocation7 + $0x80] sm:$0xff] }
 0x2ac   :  { %v549_v10 = vmax.f32 %v2628_v4, 0.0  ;;  %v510_v11 = vadd.f32 %v1689_v7, %v1645_v54  ;;  %v504_v14 = vpop.f32.mrb[3].mxu1  ;;  %v2040_v54 = vpack.c.bf16 %v688_v26, %v687_v25  ;;  %v663_v7 = vld [vmem:[#allocation7 + $0x88] sm:$0xff] }
 0x2ad   :  { %v548_v15 = vmax.f32 %v2630_v6, 0.0  ;;  %v505_v18 = vadd.f32 %v504_v14, %v399_v55  ;;  %v689_v55 = vld [vmem:[#allocation8 + $0xd0] sm:$0xff]  ;;  %v665_v6 = vld [vmem:[#allocation7 + $0x98] sm:$0xff]  ;;  %v671_v4 = vld [vmem:[#allocation7 + $0xc8] sm:$0xff] }
 0x2ae   :  { %v2634_v21 = vadd.f32 %v1369_v61, %v510_v11  ;;  %v2056_v11 = vpack.c.bf16 %v663_v7, %v662_v3  ;;  %v664_v14 = vld [vmem:[#allocation7 + $0x90] sm:$0xff] }
 0x2af   :  { %v2636_v24 = vadd.f32 %v1369_v61, %v505_v18  ;;  %v1692_v27 = vpop.f32.mrb[4].mxu1  ;;  %v2008_v28 = vpack.c.bf16 %v549_v10, %v548_v15  ;;  %v666_v18 = vld [vmem:[#allocation7 + $0xa0] sm:$0xff] }
 0x2b0   :  { %v551_v31 = vmax.f32 %v2634_v21, 0.0  ;;  %v520_v33 = vadd.f32 %v1692_v27, %v1648_v56  ;;  %v514_v34 = vpop.f32.mrb[5].mxu1  ;;  %v690_v56 = vld [vmem:[#allocation8 + $0xd8] sm:$0xff]  ;;  %v667_v27 = vld [vmem:[#allocation7 + $0xa8] sm:$0xff] }
 0x2b1   :  { %v550_v35 = vmax.f32 %v2636_v24, 0.0  ;;  %v515_v36 = vadd.f32 %v514_v34, %v409_v57  ;;  %2009 = vmatprep.subr.bf16.mxu0 %v2008_v28  ;;  %v2044_v57 = vpack.c.bf16 %v690_v56, %v689_v55  ;;  %v669_v34 = vld [vmem:[#allocation7 + $0xb8] sm:$0xff]  ;;  %v672_v24 = vld [vmem:[#allocation7 + $0xd0] sm:$0xff] }
 0x2b2   :  { %v2644_v1 = vadd.f32 %v1369_v61, %v520_v33  ;;  %2011 = vmatpush3.bf16.msra.mxu0 %v2008_v28  ;;  %v2064_v28 = vpack.c.bf16 %v667_v27, %v666_v18  ;;  %v668_v33 = vld [vmem:[#allocation7 + $0xb0] sm:$0xff]  ;;  %v673_v21 = vld [vmem:[#allocation7 + $0xd8] sm:$0xff] }
 0x2b3   :  { %v2646_v37 = vadd.f32 %v1369_v61, %v515_v36  ;;  %v1695_v38 = vpop.f32.mrb[6].mxu1  ;;  %v2012_v39 = vpack.c.bf16 %v551_v31, %v550_v35  ;;  %v2068_v36 = vpack.c.bf16 %v669_v34, %v668_v33  ;;  %v1054_v27 = vld [vmem:[#allocation8 + $0x110] sm:$0xff]  ;;  %v1056_v34 = vld [vmem:[#allocation8 + $0x120] sm:$0xff] }
 0x2b4   :  { %v553_v40 = vmax.f32 %v2644_v1, 0.0  ;;  %v530_v30 = vadd.f32 %v1695_v38, %v1651_v58  ;;  %v524_v8 = vpop.f32.mrb[7].mxu1  ;;  %v691_v58 = vld [vmem:[#allocation8 + $0xe0] sm:$0xff] }
 0x2b5   :  { %v552_v42 = vmax.f32 %v2646_v37, 0.0  ;;  %v525_v43 = vadd.f32 %v524_v8, %v419_v59  ;;  %2013 = vmatprep.subr.bf16.mxu0 %v2012_v39  ;;  %v692_v59 = vld [vmem:[#allocation8 + $0xe8] sm:$0xff]  ;;  %v670_v38 = vld [vmem:[#allocation7 + $0xc0] sm:$0xff] }
 0x2b6   :  { %v2654_v9 = vadd.f32 %v1369_v61, %v530_v30  ;;  %2015 = vmatpush3.bf16.msra.mxu0 %v2012_v39  ;;  %v2048_v60 = vpack.c.bf16 %v692_v59, %v691_v58  ;;  %v675_v37 = vld [vmem:[#allocation7 + $0xe8] sm:$0xff]  ;;  %v676_v39 = vld [vmem:[#allocation7 + $0xf0] sm:$0xff] }
 0x2b7   :  { %v2656_v45 = vadd.f32 %v1369_v61, %v525_v43  ;;  %v2016_v46 = vpack.c.bf16 %v553_v40, %v552_v42  ;;  %v693_v61 = vld [vmem:[#allocation8 + $0xf0] sm:$0xff] }
 0x2b8   :  { %v555_v12 = vmax.f32 %v2654_v9, 0.0  ;;  %v2052_v63 = vpack.c.bf16 %v694_v62, %v693_v61 }
 0x2b9   :  { %v554_v13 = vmax.f32 %v2656_v45, 0.0  ;;  %2017 = vmatprep.subr.bf16.mxu0 %v2016_v46 }
 0x2ba   :  { %2019 = vmatpush3.bf16.msra.mxu0 %v2016_v46 }
 0x2bb   :  { %v2020_v49 = vpack.c.bf16 %v555_v12, %v554_v13 }
 0x2bd   :  { %2021 = vmatprep.subr.bf16.mxu0 %v2020_v49 }
 0x2be   :  { %2023 = vmatpush3.bf16.msra.mxu0 %v2020_v49 }
 0x2bf   :  { %2025 = vmatprep.subr.bf16.mxu0 %v2024_v50 }
 0x2c1   :  { %1713 = vmatmul.mubr.msk.f32.vlgmr.msra.gmra.mrb[16].mxu0 %vm97_vm0, %v2584_v32 }
 0x2c2   :  { %1715 = vmatprep.mubr.msk.f32.mxu0 %vm97_vm0, %v2581_v29  ;;  %2027 = vmatpush3.bf16.msra.mxu0 %v2024_v50 }
 0x2c3   :  { %2029 = vmatprep.subr.bf16.mxu0 %v2028_v52 }
 0x2c5   :  { %1716 = vmatmul.mubr.msk.f32.gmra.mrb[18].mxu0 %vm97_vm0, %v2589_v0 }
 0x2c6   :  { %1718 = vmatprep.mubr.msk.f32.mxu0 %vm97_vm0, %v2595_v2  ;;  %2031 = vmatpush3.bf16.msra.mxu0 %v2028_v52 }
 0x2c7   :  { %2033 = vmatprep.subr.bf16.mxu0 %v2032_v19 }
 0x2c9   :  { %1719 = vmatmul.mubr.msk.f32.gmra.mrb[20].mxu0 %vm97_vm0, %v2600_v5 }
 0x2ca   :  { %1721 = vmatprep.mubr.msk.f32.mxu0 %vm97_vm0, %v2605_v41  ;;  %2035 = vmatpush3.bf16.msra.mxu0 %v2032_v19 }
 0x2cb   :  { %2037 = vmatprep.subr.bf16.mxu0 %v2036_v23 }
 0x2cd   :  { %1722 = vmatmul.mubr.msk.f32.gmra.mrb[22].mxu0 %vm97_vm0, %v2610_v44 }
 0x2ce   :  { %2039 = vmatpush3.bf16.msra.mxu0 %v2036_v23  ;;  %1756 = vmatprep.mubr.f32.mxu0 %v548_v15  ;;  %v2060_v15 = vpack.c.bf16 %v665_v6, %v664_v14  ;;  %v1053_v14 = vld [vmem:[#allocation8 + $0x108] sm:$0xff] }
 0x2cf   :  { %2041 = vmatprep.subr.bf16.mxu0 %v2040_v54 }
 0x2d2   :  { %2043 = vmatpush3.bf16.msra.mxu0 %v2040_v54 }
 0x2d3   :  { %2045 = vmatprep.subr.bf16.mxu0 %v2044_v57 }
 0x2d6   :  { %2047 = vmatpush3.bf16.msra.mxu0 %v2044_v57 }
 0x2d7   :  { %2049 = vmatprep.subr.bf16.mxu0 %v2048_v60 }
 0x2da   :  { %2051 = vmatpush3.bf16.msra.mxu0 %v2048_v60 }
 0x2db   :  { %2053 = vmatprep.subr.bf16.mxu0 %v2052_v63 }
 0x2de   :  { %2055 = vmatpush3.bf16.msra.mxu0 %v2052_v63 }
 0x2df   :  { %2057 = vmatprep.subr.bf16.mxu0 %v2056_v11 }
 0x2e1   :  { %1757 = vmatmul.mubr.f32.vlgmr.msra.gmra.mrb[24].mxu0 %v549_v10  ;;  %v2072_v10 = vpack.c.bf16 %v671_v4, %v670_v38  ;;  %v1058_v4 = vld [vmem:[#allocation8 + $0x130] sm:$0xff] }
 0x2e2   :  { %1759 = vmatprep.mubr.f32.mxu0 %v550_v35  ;;  %2059 = vmatpush3.bf16.msra.mxu0 %v2056_v11  ;;  %v674_v35 = vld [vmem:[#allocation7 + $0xe0] sm:$0xff] }
 0x2e3   :  { %2061 = vmatprep.subr.bf16.mxu0 %v2060_v15  ;;  %v2080_v1 = vpack.c.bf16 %v675_v37, %v674_v35  ;;  %v1052_v11 = vld [vmem:[#allocation8 + $0x100] sm:$0xff]  ;;  %v1063_v35 = vld [vmem:[#allocation8 + $0x158] sm:$0xff]  ;;  %v1065_v37 = vld [vmem:[#allocation8 + $0x168] sm:$0xff] }
 0x2e4   :  { %v2104_v18 = vpack.c.bf16 %v1053_v14, %v1052_v11 }
 0x2e5   :  { %1760 = vmatmul.mubr.f32.gmra.mrb[26].mxu0 %v551_v31  ;;  %v2076_v31 = vpack.c.bf16 %v673_v21, %v672_v24  ;;  %v1060_v21 = vld [vmem:[#allocation8 + $0x140] sm:$0xff] }
 0x2e6   :  { %1762 = vmatprep.mubr.f32.mxu0 %v552_v42  ;;  %2063 = vmatpush3.bf16.msra.mxu0 %v2060_v15 }
 0x2e7   :  { %2065 = vmatprep.subr.bf16.mxu0 %v2064_v28 }
 0x2e9   :  { %1763 = vmatmul.mubr.f32.gmra.mrb[28].mxu0 %v553_v40  ;;  %v677_v40 = vld [vmem:[#allocation7 + $0xf8] sm:$0xff] }
 0x2ea   :  { %1765 = vmatprep.mubr.f32.mxu0 %v554_v13  ;;  %2067 = vmatpush3.bf16.msra.mxu0 %v2064_v28  ;;  %v2084_v30 = vpack.c.bf16 %v677_v40, %v676_v39  ;;  %v1055_v28 = vld [vmem:[#allocation8 + $0x118] sm:$0xff]  ;;  %v1035_v40 = vld [vmem:[#allocation7 + $0x100] sm:$0xff] }
 0x2eb   :  { %2069 = vmatprep.subr.bf16.mxu0 %v2068_v36  ;;  %v2108_v33 = vpack.c.bf16 %v1055_v28, %v1054_v27  ;;  %v1067_v39 = vld [vmem:[#allocation8 + $0x178] sm:$0xff] }
 0x2ed   :  { %1766 = vmatmul.mubr.f32.gmra.mrb[30].mxu0 %v555_v12 }
 0x2ee   :  { %2071 = vmatpush3.bf16.msra.mxu0 %v2068_v36  ;;  %v1057_v36 = vld [vmem:[#allocation8 + $0x128] sm:$0xff] }
 0x2ef   :  { %2073 = vmatprep.subr.bf16.mxu0 %v2072_v10  ;;  %v2112_v38 = vpack.c.bf16 %v1057_v36, %v1056_v34 }
 0x2f2   :  { %2075 = vmatpush3.bf16.msra.mxu0 %v2072_v10  ;;  %v1059_v10 = vld [vmem:[#allocation8 + $0x138] sm:$0xff] }
 0x2f3   :  { %2077 = vmatprep.subr.bf16.mxu0 %v2076_v31  ;;  %v2116_v24 = vpack.c.bf16 %v1059_v10, %v1058_v4 }
 0x2f6   :  { %2079 = vmatpush3.bf16.msra.mxu0 %v2076_v31  ;;  %v1061_v31 = vld [vmem:[#allocation8 + $0x148] sm:$0xff] }
 0x2f7   :  { %2081 = vmatprep.subr.bf16.mxu0 %v2080_v1 }
 0x2fa   :  { %2083 = vmatpush3.bf16.msra.mxu0 %v2080_v1  ;;  %v1066_v1 = vld [vmem:[#allocation8 + $0x170] sm:$0xff] }
 0x2fb   :  { %2085 = vmatprep.subr.bf16.mxu0 %v2084_v30 }
 0x2fe   :  { %2087 = vmatpush3.bf16.msra.mxu0 %v2084_v30  ;;  %v1036_v30 = vld [vmem:[#allocation7 + $0x108] sm:$0xff] }
 0x394   :  { %v1714_v8 = vpop.f32.mrb[16].mxu0 }
 0x395   :  { %v622_v42 = vpop.f32.mrb[17].mxu0 }
 0x396   :  { %1800 = vmatprep.mubr.f32.mxu0 %v622_v42  ;;  %v1038_v42 = vld [vmem:[#allocation7 + $0x118] sm:$0xff] }
 0x397   :  { %1801 = vmatmul.mubr.f32.vlgmr.msra.gmra.mrb[24].mxu0 %v1714_v8  ;;  %v2136_v8 = vpack.c.bf16 %v1036_v30, %v1035_v40 }
 0x398   :  { %v1717_v43 = vpop.f32.mrb[18].mxu0 }
 0x399   :  { %v632_v9 = vpop.f32.mrb[19].mxu0 }
 0x39a   :  { %1803 = vmatprep.mubr.f32.mxu0 %v632_v9  ;;  %v1039_v9 = vld [vmem:[#allocation7 + $0x120] sm:$0xff] }
 0x39b   :  { %1804 = vmatmul.mubr.f32.gmra.mrb[26].mxu0 %v1717_v43 }
 0x39c   :  { %v1720_v45 = vpop.f32.mrb[20].mxu0 }
 0x39d   :  { %v642_v46 = vpop.f32.mrb[21].mxu0 }
 0x39e   :  { %1806 = vmatprep.mubr.f32.mxu0 %v642_v46 }
 0x39f   :  { %1807 = vmatmul.mubr.f32.gmra.mrb[28].mxu0 %v1720_v45  ;;  %v1040_v45 = vld [vmem:[#allocation7 + $0x128] sm:$0xff] }
 0x3a0   :  { %v1723_v12 = vpop.f32.mrb[22].mxu0  ;;  %v2144_v46 = vpack.c.bf16 %v1040_v45, %v1039_v9 }
 0x3a1   :  { %v652_v47 = vpop.f32.mrb[23].mxu0 }
 0x3a2   :  { %1809 = vmatprep.mubr.f32.mxu0 %v652_v47  ;;  %v1042_v47 = vld [vmem:[#allocation7 + $0x138] sm:$0xff] }
 0x3a3   :  { %1810 = vmatmul.mubr.f32.gmra.mrb[30].mxu0 %v1723_v12  ;;  %v1041_v12 = vld [vmem:[#allocation7 + $0x130] sm:$0xff] }
 0x46a   :  { %v1802_v13 = vpop.f32.mrb[24].mxu0 }
 0x46b   :  { %v2698_v49 = vadd.f32 %v1802_v13, %v1378_v48  ;;  %v866_v50 = vpop.f32.mrb[25].mxu0  ;;  %v1043_v13 = vld [vmem:[#allocation7 + $0x140] sm:$0xff] }
 0x46c   :  { %v2700_v51 = vadd.f32 %v1378_v48, %v866_v50 }
 0x46d   :  { %v922_v16 = vmax.f32 %v2698_v49, 0.0  ;;  %v1044_v49 = vld [vmem:[#allocation7 + $0x148] sm:$0xff] }
 0x46e   :  { %v921_v52 = vmax.f32 %v2700_v51, 0.0  ;;  %v1805_v17 = vpop.f32.mrb[26].mxu0  ;;  %v2152_v50 = vpack.c.bf16 %v1044_v49, %v1043_v13  ;;  %v1045_v51 = vld [vmem:[#allocation7 + $0x150] sm:$0xff] }
 0x46f   :  { %v2704_v53 = vadd.f32 %v1805_v17, %v1378_v48  ;;  %v876_v19 = vpop.f32.mrb[27].mxu0  ;;  %v1047_v17 = vld [vmem:[#allocation7 + $0x160] sm:$0xff] }
 0x470   :  { %v2088_v20 = vpack.c.bf16 %v922_v16, %v921_v52  ;;  %v2708_v22 = vadd.f32 %v1378_v48, %v876_v19 }
 0x471   :  { %v924_v23 = vmax.f32 %v2704_v53, 0.0  ;;  %v1048_v53 = vld [vmem:[#allocation7 + $0x168] sm:$0xff] }
 0x472   :  { %v923_v25 = vmax.f32 %v2708_v22, 0.0  ;;  %v1808_v26 = vpop.f32.mrb[28].mxu0  ;;  %2089 = vmatprep.subr.bf16.mxu1 %v2088_v20  ;;  %v2160_v19 = vpack.c.bf16 %v1048_v53, %v1047_v17  ;;  %v1050_v22 = vld [vmem:[#allocation7 + $0x178] sm:$0xff] }
 0x473   :  { %v2712_v54 = vadd.f32 %v1808_v26, %v1378_v48  ;;  %v886_v55 = vpop.f32.mrb[29].mxu0  ;;  %2091 = vmatpush3.bf16.msra.mxu1 %v2088_v20  ;;  %v1049_v20 = vld [vmem:[#allocation7 + $0x170] sm:$0xff] }
 0x474   :  { %v2092_v56 = vpack.c.bf16 %v924_v23, %v923_v25  ;;  %v2718_v57 = vadd.f32 %v1378_v48, %v886_v55 }
 0x475   :  { %v926_v58 = vmax.f32 %v2712_v54, 0.0 }
 0x476   :  { %v925_v59 = vmax.f32 %v2718_v57, 0.0  ;;  %v1811_v60 = vpop.f32.mrb[30].mxu0  ;;  %2093 = vmatprep.subr.bf16.mxu1 %v2092_v56 }
 0x477   :  { %v2722_v61 = vadd.f32 %v1811_v60, %v1378_v48  ;;  %v896_v62 = vpop.f32.mrb[31].mxu0  ;;  %2095 = vmatpush3.bf16.msra.mxu1 %v2092_v56  ;;  %v1387_v60 = vld [vmem:[#allocation10 + $0x2] ss:$0 sm:$0xff] }
 0x478   :  { %v2096_v63 = vpack.c.bf16 %v926_v58, %v925_v59  ;;  %v2728_v3 = vadd.f32 %v1378_v48, %v896_v62  ;;  %v2148_v48 = vpack.c.bf16 %v1042_v47, %v1041_v12 }
 0x479   :  { %v928_v7 = vmax.f32 %v2722_v61, 0.0 }
 0x47a   :  { %v927_v6 = vmax.f32 %v2728_v3, 0.0  ;;  %2097 = vmatprep.subr.bf16.mxu1 %v2096_v63 }
 0x47b   :  { %2099 = vmatpush3.bf16.msra.mxu1 %v2096_v63 }
 0x47c   :  { %v2100_v15 = vpack.c.bf16 %v928_v7, %v927_v6 }
 0x47e   :  { %2101 = vmatprep.subr.bf16.mxu1 %v2100_v15 }
 0x47f   :  { %2103 = vmatpush3.bf16.msra.mxu1 %v2100_v15 }
 0x480   :  { %2105 = vmatprep.subr.bf16.mxu1 %v2104_v18 }
 0x482   :  { %1829 = vmatmul.mubr.msk.f32.vlgmr.msra.gmra.mrb[8].mxu1 %vm97_vm0, %v2584_v32  ;;  %v1062_v32 = vld [vmem:[#allocation8 + $0x150] sm:$0xff] }
 0x483   :  { %1831 = vmatprep.mubr.msk.f32.mxu1 %vm97_vm0, %v2581_v29  ;;  %2107 = vmatpush3.bf16.msra.mxu1 %v2104_v18  ;;  %v2120_v29 = vpack.c.bf16 %v1061_v31, %v1060_v21 }
 0x484   :  { %2109 = vmatprep.subr.bf16.mxu1 %v2108_v33 }
 0x486   :  { %1832 = vmatmul.mubr.msk.f32.gmra.mrb[10].mxu1 %vm97_vm0, %v2589_v0  ;;  %v2124_v0 = vpack.c.bf16 %v1063_v35, %v1062_v32 }
 0x487   :  { %1834 = vmatprep.mubr.msk.f32.mxu1 %vm97_vm0, %v2595_v2  ;;  %2111 = vmatpush3.bf16.msra.mxu1 %v2108_v33  ;;  %v1064_v2 = vld [vmem:[#allocation8 + $0x160] sm:$0xff] }
 0x488   :  { %2113 = vmatprep.subr.bf16.mxu1 %v2112_v38 }
 0x48a   :  { %1835 = vmatmul.mubr.msk.f32.gmra.mrb[12].mxu1 %vm97_vm0, %v2600_v5  ;;  %v2128_v5 = vpack.c.bf16 %v1065_v37, %v1064_v2 }
 0x48b   :  { %1837 = vmatprep.mubr.msk.f32.mxu1 %vm97_vm0, %v2605_v41  ;;  %2115 = vmatpush3.bf16.msra.mxu1 %v2112_v38  ;;  %v2132_v41 = vpack.c.bf16 %v1067_v39, %v1066_v1 }
 0x48c   :  { %2117 = vmatprep.subr.bf16.mxu1 %v2116_v24 }
 0x48e   :  { %1838 = vmatmul.mubr.msk.f32.gmra.mrb[14].mxu1 %vm97_vm0, %v2610_v44  ;;  %v1037_v44 = vld [vmem:[#allocation7 + $0x110] sm:$0xff] }
 0x48f   :  { %2119 = vmatpush3.bf16.msra.mxu1 %v2116_v24  ;;  %1872 = vmatprep.mubr.f32.mxu1 %v921_v52  ;;  %v2140_v43 = vpack.c.bf16 %v1038_v42, %v1037_v44 }
 0x490   :  { %2121 = vmatprep.subr.bf16.mxu1 %v2120_v29 }
 0x493   :  { %2123 = vmatpush3.bf16.msra.mxu1 %v2120_v29 }
 0x494   :  { %2125 = vmatprep.subr.bf16.mxu1 %v2124_v0 }
 0x497   :  { %2127 = vmatpush3.bf16.msra.mxu1 %v2124_v0 }
 0x498   :  { %2129 = vmatprep.subr.bf16.mxu1 %v2128_v5 }
 0x49b   :  { %2131 = vmatpush3.bf16.msra.mxu1 %v2128_v5 }
 0x49c   :  { %2133 = vmatprep.subr.bf16.mxu1 %v2132_v41 }
 0x49f   :  { %2135 = vmatpush3.bf16.msra.mxu1 %v2132_v41 }
 0x4a0   :  { %2137 = vmatprep.subr.bf16.mxu1 %v2136_v8 }
 0x4a2   :  { %1873 = vmatmul.mubr.f32.vlgmr.msra.gmra.mrb[16].mxu1 %v922_v16  ;;  %v1046_v16 = vld [vmem:[#allocation7 + $0x158] sm:$0xff] }
 0x4a3   :  { %1875 = vmatprep.mubr.f32.mxu1 %v923_v25  ;;  %2139 = vmatpush3.bf16.msra.mxu1 %v2136_v8  ;;  %v2156_v52 = vpack.c.bf16 %v1046_v16, %v1045_v51 }
 0x4a4   :  { %2141 = vmatprep.subr.bf16.mxu1 %v2140_v43 }
 0x4a6   :  { %1876 = vmatmul.mubr.f32.gmra.mrb[18].mxu1 %v924_v23  ;;  %v2164_v23 = vpack.c.bf16 %v1050_v22, %v1049_v20 }
 0x4a7   :  { %1878 = vmatprep.mubr.f32.mxu1 %v925_v59  ;;  %2143 = vmatpush3.bf16.msra.mxu1 %v2140_v43 }
 0x4a8   :  { %2145 = vmatprep.subr.bf16.mxu1 %v2144_v46 }
 0x4aa   :  { %1879 = vmatmul.mubr.f32.gmra.mrb[20].mxu1 %v926_v58 }
 0x4ab   :  { %1881 = vmatprep.mubr.f32.mxu1 %v927_v6  ;;  %2147 = vmatpush3.bf16.msra.mxu1 %v2144_v46 }
 0x4ac   :  { %2149 = vmatprep.subr.bf16.mxu1 %v2148_v48 }
 0x4ae   :  { %1882 = vmatmul.mubr.f32.gmra.mrb[22].mxu1 %v928_v7 }
 0x4af   :  { %2151 = vmatpush3.bf16.msra.mxu1 %v2148_v48 }
 0x4b0   :  { %2153 = vmatprep.subr.bf16.mxu1 %v2152_v50 }
 0x4b3   :  { %2155 = vmatpush3.bf16.msra.mxu1 %v2152_v50 }
 0x4b4   :  { %2157 = vmatprep.subr.bf16.mxu1 %v2156_v52 }
 0x4b7   :  { %2159 = vmatpush3.bf16.msra.mxu1 %v2156_v52 }
 0x4b8   :  { %2161 = vmatprep.subr.bf16.mxu1 %v2160_v19 }
 0x4bb   :  { %2163 = vmatpush3.bf16.msra.mxu1 %v2160_v19 }
 0x4bc   :  { %2165 = vmatprep.subr.bf16.mxu1 %v2164_v23 }
 0x4bf   :  { %2167 = vmatpush3.bf16.msra.mxu1 %v2164_v23 }
 0x555   :  { %v1830_v25 = vpop.f32.mrb[8].mxu1 }
 0x556   :  { %v995_v26 = vpop.f32.mrb[9].mxu1 }
 0x557   :  { %1916 = vmatprep.mubr.f32.mxu1 %v995_v26 }
 0x558   :  { %1917 = vmatmul.mubr.f32.vlgmr.msra.gmra.mrb[16].mxu1 %v1830_v25 }
 0x559   :  { %v1833_v54 = vpop.f32.mrb[10].mxu1 }
 0x55a   :  { %v1005_v55 = vpop.f32.mrb[11].mxu1 }
 0x55b   :  { %1919 = vmatprep.mubr.f32.mxu1 %v1005_v55 }
 0x55c   :  { %1920 = vmatmul.mubr.f32.gmra.mrb[18].mxu1 %v1833_v54 }
 0x55d   :  { %v1836_v56 = vpop.f32.mrb[12].mxu1 }
 0x55e   :  { %v1015_v57 = vpop.f32.mrb[13].mxu1 }
 0x55f   :  { %1922 = vmatprep.mubr.f32.mxu1 %v1015_v57 }
 0x560   :  { %1923 = vmatmul.mubr.f32.gmra.mrb[20].mxu1 %v1836_v56 }
 0x561   :  { %v1839_v58 = vpop.f32.mrb[14].mxu1 }
 0x562   :  { %v1025_v59 = vpop.f32.mrb[15].mxu1 }
 0x563   :  { %1925 = vmatprep.mubr.f32.mxu1 %v1025_v59 }
 0x564   :  { %1926 = vmatmul.mubr.f32.gmra.mrb[22].mxu1 %v1839_v58 }
 0x62b   :  { %v1918_v61 = vpop.f32.mrb[16].mxu1 }
 0x62c   :  { %v1287_v62 = vadd.f32 %v1918_v61, %v1387_v60  ;;  %v1239_v63 = vpop.f32.mrb[17].mxu1 }
 0x62d   :  { %v1286_v3 = vadd.f32 %v1387_v60, %v1239_v63 }
 0x62e   :  { %v1295_v7 = vsub.f32 0.0, %v1287_v62 }
 0x62f   :  { %v1294_v11 = vsub.f32 0.0, %v1286_v3  ;;  %v1921_v14 = vpop.f32.mrb[18].mxu1 }
 0x630   :  { %v1304_v6 = vmul.f32 1.442695, %v1295_v7  ;;  %v1289_v15 = vadd.f32 %v1921_v14, %v1387_v60  ;;  %v1249_v18 = vpop.f32.mrb[19].mxu1 }
 0x631   :  { %v1302_v27 = vmul.f32 1.442695, %v1294_v11  ;;  %v1288_v28 = vadd.f32 %v1387_v60, %v1249_v18 }
 0x632   :  { %2218 = vpow2.f32 %v1304_v6  ;;  %v1297_v33 = vsub.f32 0.0, %v1289_v15 }
 0x633   :  { %2220 = vpow2.f32 %v1302_v27  ;;  %v1296_v34 = vsub.f32 0.0, %v1288_v28  ;;  %v1924_v36 = vpop.f32.mrb[20].mxu1 }
 0x634   :  { %v1308_v38 = vmul.f32 1.442695, %v1297_v33  ;;  %v1291_v4 = vadd.f32 %v1924_v36, %v1387_v60  ;;  %v1259_v10 = vpop.f32.mrb[21].mxu1 }
 0x635   :  { %v1306_v24 = vmul.f32 1.442695, %v1296_v34  ;;  %v1290_v21 = vadd.f32 %v1387_v60, %v1259_v10 }
 0x636   :  { %2222 = vpow2.f32 %v1308_v38  ;;  %v1299_v31 = vsub.f32 0.0, %v1291_v4 }
 0x637   :  { %2224 = vpow2.f32 %v1306_v24  ;;  %v1298_v29 = vsub.f32 0.0, %v1290_v21  ;;  %v1927_v32 = vpop.f32.mrb[22].mxu1 }
 0x638   :  { %v1312_v35 = vmul.f32 1.442695, %v1299_v31  ;;  %v1293_v0 = vadd.f32 %v1927_v32, %v1387_v60  ;;  %v1269_v2 = vpop.f32.mrb[23].mxu1 }
 0x639   :  { %v1310_v37 = vmul.f32 1.442695, %v1298_v29  ;;  %v1292_v5 = vadd.f32 %v1387_v60, %v1269_v2 }
 0x63a   :  { %2226 = vpow2.f32 %v1312_v35  ;;  %v1301_v1 = vsub.f32 0.0, %v1293_v0 }
 0x63b   :  { %2228 = vpow2.f32 %v1310_v37  ;;  %v1300_v39 = vsub.f32 0.0, %v1292_v5 }
 0x63c   :  { %v2219_v41 = vpop.eup %2218  ;;  %v1316_v40 = vmul.f32 1.442695, %v1301_v1 }
 0x63d   :  { %v2221_v30 = vpop.eup %2220  ;;  %v1319_v8 = vadd.f32 1.0, %v2219_v41  ;;  %v1314_v44 = vmul.f32 1.442695, %v1300_v39 }
 0x63e   :  { %v1318_v42 = vadd.f32 1.0, %v2221_v30  ;;  %2230 = vpow2.f32 %v1316_v40 }
 0x63f   :  { %2232 = vrcp.f32 %v1319_v8 }
 0x640   :  { %v2223_v43 = vpop.eup %2222  ;;  %2234 = vrcp.f32 %v1318_v42 }
 0x641   :  { %v2225_v9 = vpop.eup %2224  ;;  %v1321_v45 = vadd.f32 1.0, %v2223_v43  ;;  %2236 = vpow2.f32 %v1314_v44 }
 0x642   :  { %v1320_v46 = vadd.f32 1.0, %v2225_v9 }
 0x643   :  { %2238 = vrcp.f32 %v1321_v45 }
 0x644   :  { %v2227_v12 = vpop.eup %2226  ;;  %2240 = vrcp.f32 %v1320_v46 }
 0x645   :  { %v2229_v47 = vpop.eup %2228  ;;  %v1323_v48 = vadd.f32 1.0, %v2227_v12 }
 0x646   :  { %v1322_v13 = vadd.f32 1.0, %v2229_v47 }
 0x647   :  { %2242 = vrcp.f32 %v1323_v48 }
 0x648   :  { %v2231_v49 = vpop.eup %2230  ;;  %2244 = vrcp.f32 %v1322_v13 }
 0x649   :  { %v2233_v50 = vpop.eup %2232  ;;  %v1325_v51 = vadd.f32 1.0, %v2231_v49 }
 0x64a   :  { %v2235_v16 = vpop.eup %2234  ;;  %1335 = vst [vmem:[#allocation11 + $0x8] sm:$0xff] %v2233_v50 }
 0x64b   :  { %v2237_v52 = vpop.eup %2236  ;;  %1334 = vst [vmem:[#allocation11] sm:$0xff] %v2235_v16  ;;  %2246 = vrcp.f32 %v1325_v51 }
 0x64c   :  { %v1324_v17 = vadd.f32 1.0, %v2237_v52 }
 0x64d   :  { %v2239_v53 = vpop.eup %2238 }
 0x64e   :  { %v2241_v19 = vpop.eup %2240  ;;  %1337 = vst [vmem:[#allocation11 + $0x18] sm:$0xff] %v2239_v53  ;;  %2248 = vrcp.f32 %v1324_v17 }
 0x64f   :  { %1336 = vst [vmem:[#allocation11 + $0x10] sm:$0xff] %v2241_v19 }
 0x651   :  { %v2243_v20 = vpop.eup %2242 }
 0x652   :  { %v2245_v22 = vpop.eup %2244  ;;  %1339 = vst [vmem:[#allocation11 + $0x28] sm:$0xff] %v2243_v20 }
 0x653   :  { %1338 = vst [vmem:[#allocation11 + $0x20] sm:$0xff] %v2245_v22 }
 0x655   :  { %v2247_v23 = vpop.eup %2246 }
 0x656   :  { %1341 = vst [vmem:[#allocation11 + $0x38] sm:$0xff] %v2247_v23 }
 0x658   :  { %v2249_v25 = vpop.eup %2248 }
 0x659   :  { %1340 = vst [vmem:[#allocation11 + $0x30] sm:$0xff] %v2249_v25 }
 0x65a   :  { %2371 = shalt.err (!%p2368_p2)
}
 0x65b   :  { %s2372_s10 = scalar_lea.hbm %s2784_s5, 1024 }
 0x65c   :  { %p2373_p3 = scmp.ne.s32.totalorder %s2784_s5, %s2372_s10  ;;  %p2376_p4 = scmp.lt.u32.totalorder %s2372_s10, %s2784_s5 }
 0x65e   :  { %p2378_p5 = pnand %p2376_p4, %p2373_p3 }
 0x660   :  { %2381 = shalt.err (!%p2378_p5)
}
 0x661   :  { %1353 = dma.vmem_to_hbm [thread:$0]  %s1348_s21, 1024, %s2784_s5, [#allocation4], %s2392_s30, %s2392_s30, %s2393_s6  }
 0x662   :  { %2388 = dma.done.wait [#allocation4], 1024  }
 0x663   :  { %2389 = vsyncadd [#allocation4], 4294966272 }
 0x664   :  { %1357 = vsyncpa [#allocation3], 1 }
 0x665   :  { %1358 = vsyncpa [#allocation6], 1 }
 0x666   :  { %1359 = vsyncpa [#allocation9], 1 }
 0x667   :  { %1360 = vsyncpa [#allocation4], 1 }

</bundles_post_ra>
